<compile_context>
chip_gen: v7x
topology: tpu7x:2x2x1
jax: 0.10.0
libtpu: 0.0.40
codegen_flags: <defaults>
</compile_context>

<pallas_src>
import functools

import jax
import jax.numpy as jnp
from jax import lax
from jax.experimental import pallas as pl
from jax.experimental.pallas import tpu as pltpu

_NEG_BIG = -1e30  # bias for padded vocab columns (exp underflows to 0)


def _round_up(x, m):
    return (x + m - 1) // m * m


def _vmem_limit_bytes(*nbytes):
    """Scoped-VMEM limit: 1.5x the block budget + slack, clamped to [16, 64] MiB."""
    total = int(sum(int(b) for b in nbytes))
    return int(min(64 << 20, max(16 << 20, (3 * total) // 2 + (2 << 20))))


# ----------------------------------------------------------------------------
# Kernels
# ----------------------------------------------------------------------------
def _gru_recurrence_kernel(gi_ref, h0_ref, whh_ref, bhn_ref, out_ref, h_carry,
                           *, t_blk, hp, unroll):
    """Word-level GRU recurrence; grid = (N-blocks [parallel], T-blocks [arbitrary]).

    gi_ref : (t_blk, n_blk, 3Hp) bf16  x @ W_ih + b_ih + [b_hh_r, b_hh_z, 0]
    h0_ref : (n_blk, Hp)         f32   initial hidden (sentence states)
    whh_ref: (Hp, 3Hp)           bf16  recurrent weights, gate order [r, z, n]
    bhn_ref: (1, Hp)             f32   b_hh for the n gate (multiplied by r)
    out_ref: (t_blk, n_blk, Hp)  f32   hidden state at every step
    h_carry: (n_blk, Hp)         f32   VMEM scratch carried across time blocks
    """
    @pl.when(pl.program_id(1) == 0)
    def _():
        h_carry[...] = h0_ref[...]

    whh = whh_ref[...]            # bf16, resident
    bhn = bhn_ref[...]            # f32

    def step(i, h):
        gi = gi_ref[i].astype(jnp.float32)                           # (n_blk, 3Hp)
        gh = jnp.dot(h.astype(whh.dtype), whh,                       # bf16 MXU,
                     preferred_element_type=jnp.float32)             # f32 acc
        r = jax.nn.sigmoid(gi[:, 0:hp] + gh[:, 0:hp])
        z = jax.nn.sigmoid(gi[:, hp:2 * hp] + gh[:, hp:2 * hp])
        n = jnp.tanh(gi[:, 2 * hp:3 * hp] + r * (gh[:, 2 * hp:3 * hp] + bhn))
        h_new = (1.0 - z) * n + z * h
        out_ref[i] = h_new
        return h_new

    h_carry[...] = lax.fori_loop(0, t_blk, step, h_carry[...], unroll=unroll)


def _sentence_gru_kernel(x1_ref, h0_ref, wih_ref, whh_ref, bgi_ref, bhn_ref,
                         out_ref, *, n_steps, hp, unroll):
    """Sentence-level GRU; single grid step, step-0 (init_input) peeled."""
    wih = wih_ref[...]
    whh = whh_ref[...]
    bgi = bgi_ref[...]
    bhn = bhn_ref[...]

    def cell(x, h):
        gi = jnp.dot(x, wih, preferred_element_type=jnp.float32) + bgi
        gh = jnp.dot(h, whh, preferred_element_type=jnp.float32)
        r = jax.nn.sigmoid(gi[:, 0:hp] + gh[:, 0:hp])
        z = jax.nn.sigmoid(gi[:, hp:2 * hp] + gh[:, hp:2 * hp])
        n = jnp.tanh(gi[:, 2 * hp:3 * hp] + r * (gh[:, 2 * hp:3 * hp] + bhn))
        return (1.0 - z) * n + z * h

    # Step 0: input is the init_input parameter; later steps feed h back.
    h = cell(x1_ref[...], h0_ref[...])
    out_ref[0] = h

    def step(i, h):
        h_new = cell(h, h)
        out_ref[i] = h_new
        return h_new

    lax.fori_loop(1, n_steps, step, h, unroll=unroll)


def _proj_fused_kernel(h_ref, w_ref, b_ref, out_ref):
    """Output projection + log_softmax (vocab fits a single lane-dense block)."""
    h = h_ref[...].astype(w_ref.dtype)                               # bf16 operand
    logits = jnp.dot(h, w_ref[...],
                     preferred_element_type=jnp.float32) + b_ref[...]
    m = jnp.max(logits, axis=-1, keepdims=True)
    lse = m + jnp.log(jnp.sum(jnp.exp(logits - m), axis=-1, keepdims=True))
    out_ref[...] = (logits - lse).astype(out_ref.dtype)


def _proj_lse_kernel(h_ref, w_ref, b_ref, lse_ref, m_sc, l_sc):
    """Pass 1 of the V-tiled projection: online logsumexp over vocab blocks."""
    vb = pl.program_id(1)

    @pl.when(vb == 0)
    def _():
        m_sc[...] = jnp.full_like(m_sc, -jnp.inf)
        l_sc[...] = jnp.zeros_like(l_sc)

    h = h_ref[...].astype(w_ref.dtype)
    logits = jnp.dot(h, w_ref[...],
                     preferred_element_type=jnp.float32) + b_ref[...]
    m_prev = m_sc[...]
    m_new = jnp.maximum(m_prev, jnp.max(logits, axis=-1, keepdims=True))
    l_sc[...] = (l_sc[...] * jnp.exp(m_prev - m_new)
                 + jnp.sum(jnp.exp(logits - m_new), axis=-1, keepdims=True))
    m_sc[...] = m_new

    @pl.when(vb == pl.num_programs(1) - 1)
    def _():
        lse_ref[...] = m_sc[...] + jnp.log(l_sc[...])


def _proj_logp_kernel(h_ref, w_ref, b_ref, lse_ref, out_ref):
    """Pass 2 of the V-tiled projection: recompute logits and subtract lse."""
    h = h_ref[...].astype(w_ref.dtype)
    logits = jnp.dot(h, w_ref[...],
                     preferred_element_type=jnp.float32) + b_ref[...]
    out_ref[...] = (logits - lse_ref[...]).astype(out_ref.dtype)


# ----------------------------------------------------------------------------
# pallas_call wrappers
# ----------------------------------------------------------------------------
def _run_gru_recurrence(gi, h0, w_hh, b_hn, *, t_blk, n_blk, unroll):
    s_pad, np_, g3 = gi.shape
    hp = h0.shape[1]
    kernel = functools.partial(_gru_recurrence_kernel, t_blk=t_blk, hp=hp,
                               unroll=unroll)
    gi_blk = t_blk * n_blk * g3 * gi.dtype.itemsize
    out_blk = t_blk * n_blk * hp * 4
    const = (hp * g3 * w_hh.dtype.itemsize + hp * 4
             + n_blk * hp * 4 + n_blk * hp * 4)
    return pl.pallas_call(
        kernel,
        out_shape=jax.ShapeDtypeStruct((s_pad, np_, hp), jnp.float32),
        grid_spec=pltpu.PrefetchScalarGridSpec(
            num_scalar_prefetch=0,
            grid=(np_ // n_blk, s_pad // t_blk),
            in_specs=[
                pl.BlockSpec((t_blk, n_blk, g3), lambda nb, tb: (tb, nb, 0)),  # gi
                pl.BlockSpec((n_blk, hp), lambda nb, tb: (nb, 0)),             # h0
                pl.BlockSpec((hp, g3), lambda nb, tb: (0, 0)),                 # W_hh
                pl.BlockSpec((1, hp), lambda nb, tb: (0, 0)),                  # b_hh[n]
            ],
            out_specs=pl.BlockSpec((t_blk, n_blk, hp), lambda nb, tb: (tb, nb, 0)),
            scratch_shapes=[pltpu.VMEM((n_blk, hp), jnp.float32)],
        ),
        compiler_params=pltpu.CompilerParams(
            dimension_semantics=("parallel", "arbitrary"),
            vmem_limit_bytes=_vmem_limit_bytes(2 * gi_blk, 2 * out_blk, 2 * const),
        ),
    )(gi, h0, w_hh, b_hn)


def _run_sentence_gru(x1, h0, w_ih, w_hh, b_gi, b_hn, *, n_steps, unroll):
    bp, hp = h0.shape
    g3 = w_ih.shape[1]
    kernel = functools.partial(_sentence_gru_kernel, n_steps=n_steps, hp=hp,
                               unroll=unroll)
    return pl.pallas_call(
        kernel,
        out_shape=jax.ShapeDtypeStruct((n_steps, bp, hp), jnp.float32),
        grid_spec=pltpu.PrefetchScalarGridSpec(
            num_scalar_prefetch=0,
            grid=(1,),
            in_specs=[
                pl.BlockSpec((bp, hp), lambda b: (0, 0)),    # x1 (init_input)
                pl.BlockSpec((bp, hp), lambda b: (0, 0)),    # h0
                pl.BlockSpec((hp, g3), lambda b: (0, 0)),    # W_ih
                pl.BlockSpec((hp, g3), lambda b: (0, 0)),    # W_hh
                pl.BlockSpec((1, g3), lambda b: (0, 0)),     # b_ih + b_hh[r,z]
                pl.BlockSpec((1, hp), lambda b: (0, 0)),     # b_hh[n]
            ],
            out_specs=pl.BlockSpec((n_steps, bp, hp), lambda b: (0, 0, 0)),
        ),
        compiler_params=pltpu.CompilerParams(
            dimension_semantics=("arbitrary",),
            vmem_limit_bytes=_vmem_limit_bytes(
                2 * n_steps * bp * hp * 4, 4 * hp * g3 * 4, 6 * bp * hp * 4),
        ),
    )(x1, h0, w_ih, w_hh, b_gi, b_hn)


def _run_projection(h2d, w_out, b_out, *, m_blk, v_blk, out_dtype):
    m_pad, hp = h2d.shape
    vp = w_out.shape[1]
    n_mblk = m_pad // m_blk
    n_vblk = vp // v_blk
    out_isz = jnp.dtype(out_dtype).itemsize
    flops = 2 * m_pad * hp * vp
    bytes_acc = (m_pad * hp * h2d.dtype.itemsize
                 + hp * vp * w_out.dtype.itemsize + m_pad * vp * out_isz)

    if n_vblk == 1:
        # Fused projection + log_softmax (small vocab: single lane-dense block).
        return pl.pallas_call(
            _proj_fused_kernel,
            out_shape=jax.ShapeDtypeStruct((m_pad, vp), out_dtype),
            grid_spec=pltpu.PrefetchScalarGridSpec(
                num_scalar_prefetch=0,
                grid=(n_mblk,),
                in_specs=[
                    pl.BlockSpec((m_blk, hp), lambda mb: (mb, 0)),
                    pl.BlockSpec((hp, vp), lambda mb: (0, 0)),
                    pl.BlockSpec((1, vp), lambda mb: (0, 0)),
                ],
                out_specs=pl.BlockSpec((m_blk, vp), lambda mb: (mb, 0)),
            ),
            compiler_params=pltpu.CompilerParams(
                dimension_semantics=("parallel",),
                vmem_limit_bytes=_vmem_limit_bytes(
                    2 * m_blk * hp * h2d.dtype.itemsize,
                    2 * hp * vp * w_out.dtype.itemsize,
                    2 * vp * 4,
                    2 * m_blk * vp * out_isz,
                    m_blk * vp * 4),
            ),
            cost_estimate=pl.CostEstimate(flops=flops, transcendentals=m_pad * vp,
                                          bytes_accessed=bytes_acc),
        )(h2d, w_out, b_out)

    # Large-vocab path (v7x-friendly): V-tiled online logsumexp, then logits-lse.
    common_vmem = _vmem_limit_bytes(
        2 * m_blk * hp * h2d.dtype.itemsize,
        2 * hp * v_blk * w_out.dtype.itemsize,
        2 * v_blk * 4,
        2 * m_blk * v_blk * out_isz,
        m_blk * v_blk * 4,
        6 * m_blk * 4)

    lse = pl.pallas_call(
        _proj_lse_kernel,
        out_shape=jax.ShapeDtypeStruct((m_pad, 1), jnp.float32),
        grid_spec=pltpu.PrefetchScalarGridSpec(
            num_scalar_prefetch=0,
            grid=(n_mblk, n_vblk),
            in_specs=[
                pl.BlockSpec((m_blk, hp), lambda mb, vb: (mb, 0)),
                pl.BlockSpec((hp, v_blk), lambda mb, vb: (0, vb)),
                pl.BlockSpec((1, v_blk), lambda mb, vb: (0, vb)),
            ],
            out_specs=pl.BlockSpec((m_blk, 1), lambda mb, vb: (mb, 0)),
            scratch_shapes=[pltpu.VMEM((m_blk, 1), jnp.float32),
                            pltpu.VMEM((m_blk, 1), jnp.float32)],
        ),
        compiler_params=pltpu.CompilerParams(
            dimension_semantics=("parallel", "arbitrary"),
            vmem_limit_bytes=common_vmem,
        ),
        cost_estimate=pl.CostEstimate(flops=flops, transcendentals=m_pad * vp,
                                      bytes_accessed=bytes_acc),
    )(h2d, w_out, b_out)

    return pl.pallas_call(
        _proj_logp_kernel,
        out_shape=jax.ShapeDtypeStruct((m_pad, vp), out_dtype),
        grid_spec=pltpu.PrefetchScalarGridSpec(
            num_scalar_prefetch=0,
            grid=(n_mblk, n_vblk),
            in_specs=[
                pl.BlockSpec((m_blk, hp), lambda mb, vb: (mb, 0)),
                pl.BlockSpec((hp, v_blk), lambda mb, vb: (0, vb)),
                pl.BlockSpec((1, v_blk), lambda mb, vb: (0, vb)),
                pl.BlockSpec((m_blk, 1), lambda mb, vb: (mb, 0)),
            ],
            out_specs=pl.BlockSpec((m_blk, v_blk), lambda mb, vb: (mb, vb)),
        ),
        compiler_params=pltpu.CompilerParams(
            dimension_semantics=("parallel", "parallel"),
            vmem_limit_bytes=common_vmem,
        ),
        cost_estimate=pl.CostEstimate(flops=flops, transcendentals=0,
                                      bytes_accessed=bytes_acc),
    )(h2d, w_out, b_out, lse)


# ----------------------------------------------------------------------------
# ReviewHiRNN forward
# ----------------------------------------------------------------------------
def review_hirnn_forward(state, rvw_lens, target_var, params, *,
                         t_blk=64, n_blk=32, proj_m_blk=256, proj_v_blk=None,
                         stream_dtype=jnp.bfloat16, out_dtype=jnp.float32):
    """Teacher-forcing forward pass of ReviewHiRNN.

    Args:
      state     : (B, d_state) float32 user-item vectors.
      rvw_lens  : tuple/list of B Python ints (sentences per review).
      target_var: (S, N) int32 target word ids, N = sum(rvw_lens).
      params    : dict of weights (see init_params).
      t_blk/n_blk: time / sentence block of the word-level recurrence.
      proj_m_blk : row block of the output projection (128 on v5e, 256 v6e/v7x).
      proj_v_blk : vocab block; None = auto (fused if Vp <= 4096 else 2048).
      stream_dtype: dtype of the DMA-heavy gi stream / resident weights (bf16).
    Returns:
      (S, N, n_words) log-probabilities in `out_dtype`.
    """
    rvw_lens = tuple(int(l) for l in rvw_lens)
    B = state.shape[0]
    S, N = target_var.shape
    assert len(rvw_lens) == B and sum(rvw_lens) == N
    L = max(rvw_lens)

    H = params["w_hh_t"].shape[0]
    V = params["w_out"].shape[1]
    f32 = jnp.float32
    HIGH = jax.lax.Precision.HIGHEST

    # Lane/sublane-aligned padded sizes.
    Hp = _round_up(H, 128)
    Bp = _round_up(B, 8)

    # Word-recurrence tiling (clamped so tiny problems don't over-pad).
    t_blk = max(8, min(t_blk, _round_up(S, 8)))
    n_blk = max(8, min(n_blk, _round_up(N, 8)))
    S_pad = _round_up(S, t_blk)
    Np = _round_up(N, n_blk)
    unroll_t = min(8, t_blk)

    # Projection tiling.
    M = S_pad * Np
    m_blk = max(8, min(_round_up(proj_m_blk, 8), M))
    M_pad = _round_up(M, m_blk)
    if proj_v_blk is None:
        v_blk = _round_up(V, 128) if _round_up(V, 128) <= 4096 else 2048
    else:
        v_blk = _round_up(proj_v_blk, 128)
    Vp = _round_up(V, v_blk)

    def pad_gate_cols(w):
        # (..., 3H) -> (..., 3Hp): pad each of the [r | z | n] blocks to Hp.
        r, z, n = jnp.split(w, 3, axis=-1)
        pad = [(0, 0)] * (w.ndim - 1) + [(0, Hp - H)]
        return jnp.concatenate(
            [jnp.pad(r, pad), jnp.pad(z, pad), jnp.pad(n, pad)], axis=-1)

    def pad_rows(w, rows):
        return jnp.pad(w, ((0, rows - w.shape[0]),) + ((0, 0),) * (w.ndim - 1))

    # ------------------ Phase 1: review_state (sentence-level GRU) -----------
    # TODO(synk): RNNStateAdaptor is not defined in the provided spec; modelled
    #             here as Linear(d_state, d_hidden) + tanh for n_layers == 1.
    h_sent0 = jnp.tanh(jnp.dot(state, params["w_to_hidden"], precision=HIGH)
                       + params["b_to_hidden"])                        # (B, H)
    h_sent0_p = jnp.pad(h_sent0, ((0, Bp - B), (0, Hp - H)))

    x1 = jnp.broadcast_to(params["init_input"][None, :], (B, H))
    x1_p = jnp.pad(x1, ((0, Bp - B), (0, Hp - H)))

    wih_s = pad_rows(pad_gate_cols(params["w_ih_s"]), Hp)              # (Hp, 3Hp)
    whh_s = pad_rows(pad_gate_cols(params["w_hh_s"]), Hp)              # (Hp, 3Hp)
    bgi_s = pad_gate_cols(
        (params["b_ih_s"]
         + jnp.concatenate([params["b_hh_s"][:2 * H],
                            jnp.zeros((H,), f32)]))[None, :])           # (1, 3Hp)
    bhn_s = jnp.pad(params["b_hh_s"][2 * H:][None, :],
                    ((0, 0), (0, Hp - H)))                              # (1, Hp)

    sent_h = _run_sentence_gru(x1_p, h_sent0_p, wih_s, whh_s, bgi_s, bhn_s,
                               n_steps=L,
                               unroll=min(8, max(1, L - 1)))            # (L, Bp, Hp)

    # Ragged gather (static lengths): [review0 t=0..l0-1, review1 t=0..l1-1, ...]
    sen_state_seq = jnp.concatenate(
        [sent_h[:l, i, :] for i, l in enumerate(rvw_lens)], axis=0)     # (N, Hp)
    h0_word = pad_rows(sen_state_seq, Np)                               # (Np, Hp)

    # ------------------ Phase 2: TextRNN (teacher forcing) -------------------
    # Hoisted input projection: fold Embedding @ W_ih (+ b_ih + b_hh[r,z]) into
    # the embedding table once (f32), cast the table to bf16, then gather ->
    # the serial loop only streams gi (bf16) and does h @ W_hh + gates.
    bgi_t = params["b_ih_t"] + jnp.concatenate(
        [params["b_hh_t"][:2 * H], jnp.zeros((H,), f32)])
    gi_table = jnp.dot(params["word_ebd"], params["w_ih_t"],
                       precision=HIGH) + bgi_t                          # (Vocab, 3H)
    gi = pad_gate_cols(gi_table).astype(stream_dtype)[target_var]       # (S, N, 3Hp)
    gi = jnp.pad(gi, ((0, S_pad - S), (0, Np - N), (0, 0)))             # (S_pad, Np, 3Hp)

    whh_t = pad_rows(pad_gate_cols(params["w_hh_t"]),
                     Hp).astype(stream_dtype)                           # (Hp, 3Hp)
    bhn_t = jnp.pad(params["b_hh_t"][2 * H:][None, :],
                    ((0, 0), (0, Hp - H)))                              # (1, Hp)

    h_words = _run_gru_recurrence(gi, h0_word, whh_t, bhn_t,
                                  t_blk=t_blk, n_blk=n_blk,
                                  unroll=unroll_t)                      # (S_pad, Np, Hp)

    # Output projection + log_softmax on a lane-preserving 2-D view (M = S_pad*Np).
    h2d = h_words.reshape(S_pad * Np, Hp)
    if M_pad > M:
        h2d = jnp.pad(h2d, ((0, M_pad - M), (0, 0)))
    w_out = jnp.pad(params["w_out"],
                    ((0, Hp - H), (0, Vp - V))).astype(stream_dtype)    # (Hp, Vp)
    b_out = jnp.pad(params["b_out"][None, :], ((0, 0), (0, Vp - V)),
                    constant_values=_NEG_BIG)                           # (1, Vp)

    logp = _run_projection(h2d, w_out, b_out, m_blk=m_blk, v_blk=v_blk,
                           out_dtype=out_dtype)                         # (M_pad, Vp)
    logp = logp[:M].reshape(S_pad, Np, Vp)
    return logp[:S, :N, :V]


# ----------------------------------------------------------------------------
# Parameters & pure-JAX reference
# ----------------------------------------------------------------------------
def init_params(key, d_state, d_hidden, n_words, word_ebd_size):
    """Synthetic parameters with the module's shapes (GRU weights pre-transposed,
    gate order [r, z, n])."""
    ks = jax.random.split(key, 14)
    s = 0.1
    H = d_hidden
    nrm = lambda k, shp: s * jax.random.normal(k, shp, jnp.float32)
    return {
        # RNNStateAdaptor (assumed Linear + tanh).
        "w_to_hidden": nrm(ks[0], (d_state, H)),
        "b_to_hidden": nrm(ks[1], (H,)),
        # ReviewHiRNN.init_input (zeros in the module; random here to exercise it).
        "init_input": nrm(ks[2], (H,)),
        # Sentence-level GRU (d_hidden -> d_hidden).
        "w_ih_s": nrm(ks[3], (H, 3 * H)),
        "w_hh_s": nrm(ks[4], (H, 3 * H)),
        "b_ih_s": nrm(ks[5], (3 * H,)),
        "b_hh_s": nrm(ks[6], (3 * H,)),
        # TextRNN word embedding.
        "word_ebd": nrm(ks[7], (n_words, word_ebd_size)),
        # Word-level GRU (word_ebd_size -> d_hidden).
        "w_ih_t": nrm(ks[8], (word_ebd_size, 3 * H)),
        "w_hh_t": nrm(ks[9], (H, 3 * H)),
        "b_ih_t": nrm(ks[10], (3 * H,)),
        "b_hh_t": nrm(ks[11], (3 * H,)),
        # Output projection.
        "w_out": nrm(ks[12], (H, n_words)),
        "b_out": nrm(ks[13], (n_words,)),
    }


def review_hirnn_reference(state, rvw_lens, target_var, params):
    """Pure-JAX reference mirroring the PyTorch module (eval, tf_rate=1, 1-layer GRU)."""
    H = params["w_hh_t"].shape[0]
    HIGH = jax.lax.Precision.HIGHEST

    def gru_cell(x, h, wih, whh, bih, bhh):
        gi = jnp.dot(x, wih, precision=HIGH) + bih
        gh = jnp.dot(h, whh, precision=HIGH) + bhh
        r = jax.nn.sigmoid(gi[:, :H] + gh[:, :H])
        z = jax.nn.sigmoid(gi[:, H:2 * H] + gh[:, H:2 * H])
        n = jnp.tanh(gi[:, 2 * H:] + r * gh[:, 2 * H:])
        return (1.0 - z) * n + z * h

    B = state.shape[0]
    h = jnp.tanh(jnp.dot(state, params["w_to_hidden"], precision=HIGH)
                 + params["b_to_hidden"])
    x = jnp.broadcast_to(params["init_input"][None, :], (B, H))
    outs = []
    for _ in range(max(rvw_lens)):
        h = gru_cell(x, h, params["w_ih_s"], params["w_hh_s"],
                     params["b_ih_s"], params["b_hh_s"])
        x = h
        outs.append(h)
    out_var = jnp.stack(outs, axis=0)                                   # (L, B, H)
    sen_state = jnp.concatenate(
        [out_var[:l, i] for i, l in enumerate(rvw_lens)], axis=0)       # (N, H)

    emb = params["word_ebd"][target_var]                                # (S, N, Din)

    def step(h, x):
        h_new = gru_cell(x, h, params["w_ih_t"], params["w_hh_t"],
                         params["b_ih_t"], params["b_hh_t"])
        logits = jnp.dot(h_new, params["w_out"], precision=HIGH) + params["b_out"]
        return h_new, jax.nn.log_softmax(logits, axis=-1)

    _, out = lax.scan(step, sen_state, emb)
    return out                                                          # (S, N, V)


if __name__ == "__main__":
    # Small shapes consistent with the module's forward.
    batch = 2                        # number of reviews
    rvw_lens = (3, 2)                # sentences per review -> N = 5 sentence states
    seq_len = 8                      # words per sentence (teacher-forcing targets)
    d_state, d_hidden = 16, 32
    n_words, word_ebd_size = 200, 32

    key = jax.random.PRNGKey(0)
    k_par, k_state, k_tgt = jax.random.split(key, 3)

    params = init_params(k_par, d_state, d_hidden, n_words, word_ebd_size)
    state = 0.1 * jax.random.normal(k_state, (batch, d_state), jnp.float32)
    n_sent = sum(rvw_lens)
    target_var = jax.random.randint(k_tgt, (seq_len, n_sent), 0, n_words, jnp.int32)

    ref = review_hirnn_reference(state, rvw_lens, target_var, params)

    # Path 1: fused projection (vocab fits a single lane-dense block).
    out = jax.block_until_ready(
        review_hirnn_forward(state, rvw_lens, target_var, params))
    assert out.shape == (seq_len, n_sent, n_words)
    err = float(jnp.max(jnp.abs(out - ref)))
    assert err < 3e-2, f"fused-projection path: max abs err {err}"

    # Path 2: vocab-tiled online-logsumexp projection (large-vocab / v7x path).
    out_tiled = jax.block_until_ready(
        review_hirnn_forward(state, rvw_lens, target_var, params, proj_v_blk=128))
    assert out_tiled.shape == (seq_len, n_sent, n_words)
    err_t = float(jnp.max(jnp.abs(out_tiled - ref)))
    assert err_t < 3e-2, f"V-tiled projection path: max abs err {err_t}"

    print("KERNEL_OK")
</pallas_src>

<mosaic_0001>
module attributes {stable_mosaic.version = 11 : i64} {
  func.func @_sentence_gru_kernel(%arg0: i32, %arg1: memref<8x128xf32, #tpu.memory_space<vmem>>, %arg2: memref<8x128xf32, #tpu.memory_space<vmem>>, %arg3: memref<128x384xf32, #tpu.memory_space<vmem>>, %arg4: memref<128x384xf32, #tpu.memory_space<vmem>>, %arg5: memref<1x384xf32, #tpu.memory_space<vmem>>, %arg6: memref<1x128xf32, #tpu.memory_space<vmem>>, %arg7: memref<3x8x128xf32, #tpu.memory_space<vmem>>) attributes {dimension_semantics = [#tpu.dimension_semantics<arbitrary>], iteration_bounds = array<i64: 1>, scalar_prefetch = 0 : i64, scratch_operands = 0 : i64, tpu.core_type = #tpu.core_type<tc>, window_params = [{pipeline_mode = #tpu.pipeline_mode<synchronous>, transform_indices = @transform_0, window_bounds = array<i64: 8, 128>}, {pipeline_mode = #tpu.pipeline_mode<synchronous>, transform_indices = @transform_1, window_bounds = array<i64: 8, 128>}, {pipeline_mode = #tpu.pipeline_mode<synchronous>, transform_indices = @transform_2, window_bounds = array<i64: 128, 384>}, {pipeline_mode = #tpu.pipeline_mode<synchronous>, transform_indices = @transform_3, window_bounds = array<i64: 128, 384>}, {pipeline_mode = #tpu.pipeline_mode<synchronous>, transform_indices = @transform_4, window_bounds = array<i64: 1, 384>}, {pipeline_mode = #tpu.pipeline_mode<synchronous>, transform_indices = @transform_5, window_bounds = array<i64: 1, 128>}, {pipeline_mode = #tpu.pipeline_mode<synchronous>, transform_indices = @transform_6, window_bounds = array<i64: 3, 8, 128>}]} {
    %c0 = arith.constant 0 : index
    %c0_0 = arith.constant 0 : index
    %0 = vector.load %arg3[%c0, %c0_0] : memref<128x384xf32, #tpu.memory_space<vmem>>, vector<128x384xf32>
    %c0_1 = arith.constant 0 : index
    %c0_2 = arith.constant 0 : index
    %1 = vector.load %arg4[%c0_1, %c0_2] : memref<128x384xf32, #tpu.memory_space<vmem>>, vector<128x384xf32>
    %c0_3 = arith.constant 0 : index
    %c0_4 = arith.constant 0 : index
    %2 = vector.load %arg5[%c0_3, %c0_4] : memref<1x384xf32, #tpu.memory_space<vmem>>, vector<1x384xf32>
    %c0_5 = arith.constant 0 : index
    %c0_6 = arith.constant 0 : index
    %3 = vector.load %arg6[%c0_5, %c0_6] : memref<1x128xf32, #tpu.memory_space<vmem>>, vector<1x128xf32>
    %c0_7 = arith.constant 0 : index
    %c0_8 = arith.constant 0 : index
    %4 = vector.load %arg1[%c0_7, %c0_8] : memref<8x128xf32, #tpu.memory_space<vmem>>, vector<8x128xf32>
    %c0_9 = arith.constant 0 : index
    %c0_10 = arith.constant 0 : index
    %5 = vector.load %arg2[%c0_9, %c0_10] : memref<8x128xf32, #tpu.memory_space<vmem>>, vector<8x128xf32>
    %cst = arith.constant dense<0.000000e+00> : vector<8x384xf32>
    %6 = tpu.matmul %4, %0, %cst {dimension_numbers = #tpu.dot_dimension_numbers<[1], [0], [0], [1], [0, 0, 1, 1], [], []>} : vector<8x128xf32>, vector<128x384xf32>, vector<8x384xf32> -> vector<8x384xf32>
    %7 = vector.broadcast %2 : vector<1x384xf32> to vector<8x384xf32>
    %8 = arith.addf %6, %7 : vector<8x384xf32>
    %cst_11 = arith.constant dense<0.000000e+00> : vector<8x384xf32>
    %9 = tpu.matmul %5, %1, %cst_11 {dimension_numbers = #tpu.dot_dimension_numbers<[1], [0], [0], [1], [0, 0, 1, 1], [], []>} : vector<8x128xf32>, vector<128x384xf32>, vector<8x384xf32> -> vector<8x384xf32>
    %10 = vector.extract_strided_slice %8 {offsets = [0, 0], sizes = [8, 128], strides = [1, 1]} : vector<8x384xf32> to vector<8x128xf32>
    %11 = vector.extract_strided_slice %9 {offsets = [0, 0], sizes = [8, 128], strides = [1, 1]} : vector<8x384xf32> to vector<8x128xf32>
    %12 = arith.addf %10, %11 : vector<8x128xf32>
    %13 = arith.negf %12 : vector<8x128xf32>
    %14 = math.exp %13 : vector<8x128xf32>
    %cst_12 = arith.constant 1.000000e+00 : f32
    %15 = vector.broadcast %cst_12 : f32 to vector<8x128xf32>
    %16 = arith.addf %15, %14 : vector<8x128xf32>
    %17 = arith.divf %15, %16 : vector<8x128xf32>
    %18 = vector.extract_strided_slice %8 {offsets = [0, 128], sizes = [8, 128], strides = [1, 1]} : vector<8x384xf32> to vector<8x128xf32>
    %19 = vector.extract_strided_slice %9 {offsets = [0, 128], sizes = [8, 128], strides = [1, 1]} : vector<8x384xf32> to vector<8x128xf32>
    %20 = arith.addf %18, %19 : vector<8x128xf32>
    %21 = arith.negf %20 : vector<8x128xf32>
    %22 = math.exp %21 : vector<8x128xf32>
    %cst_13 = arith.constant 1.000000e+00 : f32
    %23 = vector.broadcast %cst_13 : f32 to vector<8x128xf32>
    %24 = arith.addf %23, %22 : vector<8x128xf32>
    %25 = arith.divf %23, %24 : vector<8x128xf32>
    %26 = vector.extract_strided_slice %8 {offsets = [0, 256], sizes = [8, 128], strides = [1, 1]} : vector<8x384xf32> to vector<8x128xf32>
    %27 = vector.extract_strided_slice %9 {offsets = [0, 256], sizes = [8, 128], strides = [1, 1]} : vector<8x384xf32> to vector<8x128xf32>
    %28 = vector.broadcast %3 : vector<1x128xf32> to vector<8x128xf32>
    %29 = arith.addf %27, %28 : vector<8x128xf32>
    %30 = arith.mulf %17, %29 : vector<8x128xf32>
    %31 = arith.addf %26, %30 : vector<8x128xf32>
    %32 = math.tanh %31 : vector<8x128xf32>
    %cst_14 = arith.constant 1.000000e+00 : f32
    %33 = vector.broadcast %cst_14 : f32 to vector<8x128xf32>
    %34 = arith.subf %33, %25 : vector<8x128xf32>
    %35 = arith.mulf %34, %32 : vector<8x128xf32>
    %36 = arith.mulf %25, %5 : vector<8x128xf32>
    %37 = arith.addf %35, %36 : vector<8x128xf32>
    %c0_15 = arith.constant 0 : index
    %c0_16 = arith.constant 0 : index
    %c0_17 = arith.constant 0 : index
    %38 = vector.load %arg7[%c0_15, %c0_16, %c0_17] : memref<3x8x128xf32, #tpu.memory_space<vmem>>, vector<1x8x128xf32>
    %39 = vector.shape_cast %38 : vector<1x8x128xf32> to vector<8x128xf32>
    %40 = vector.shape_cast %37 : vector<8x128xf32> to vector<1x8x128xf32>
    tpu.vector_store %arg7[%c0_15, %c0_16, %c0_17], %40 {strides = array<i32>} : memref<3x8x128xf32, #tpu.memory_space<vmem>>, vector<1x8x128xf32>,
    %c1_i32 = arith.constant 1 : i32
    %cst_18 = arith.constant dense<0.000000e+00> : vector<8x384xf32>
    %41 = tpu.matmul %37, %0, %cst_18 {dimension_numbers = #tpu.dot_dimension_numbers<[1], [0], [0], [1], [0, 0, 1, 1], [], []>} : vector<8x128xf32>, vector<128x384xf32>, vector<8x384xf32> -> vector<8x384xf32>
    %42 = vector.broadcast %2 : vector<1x384xf32> to vector<8x384xf32>
    %43 = arith.addf %41, %42 : vector<8x384xf32>
    %cst_19 = arith.constant dense<0.000000e+00> : vector<8x384xf32>
    %44 = tpu.matmul %37, %1, %cst_19 {dimension_numbers = #tpu.dot_dimension_numbers<[1], [0], [0], [1], [0, 0, 1, 1], [], []>} : vector<8x128xf32>, vector<128x384xf32>, vector<8x384xf32> -> vector<8x384xf32>
    %45 = vector.extract_strided_slice %43 {offsets = [0, 0], sizes = [8, 128], strides = [1, 1]} : vector<8x384xf32> to vector<8x128xf32>
    %46 = vector.extract_strided_slice %44 {offsets = [0, 0], sizes = [8, 128], strides = [1, 1]} : vector<8x384xf32> to vector<8x128xf32>
    %47 = arith.addf %45, %46 : vector<8x128xf32>
    %48 = arith.negf %47 : vector<8x128xf32>
    %49 = math.exp %48 : vector<8x128xf32>
    %cst_20 = arith.constant 1.000000e+00 : f32
    %50 = vector.broadcast %cst_20 : f32 to vector<8x128xf32>
    %51 = arith.addf %50, %49 : vector<8x128xf32>
    %52 = arith.divf %50, %51 : vector<8x128xf32>
    %53 = vector.extract_strided_slice %43 {offsets = [0, 128], sizes = [8, 128], strides = [1, 1]} : vector<8x384xf32> to vector<8x128xf32>
    %54 = vector.extract_strided_slice %44 {offsets = [0, 128], sizes = [8, 128], strides = [1, 1]} : vector<8x384xf32> to vector<8x128xf32>
    %55 = arith.addf %53, %54 : vector<8x128xf32>
    %56 = arith.negf %55 : vector<8x128xf32>
    %57 = math.exp %56 : vector<8x128xf32>
    %cst_21 = arith.constant 1.000000e+00 : f32
    %58 = vector.broadcast %cst_21 : f32 to vector<8x128xf32>
    %59 = arith.addf %58, %57 : vector<8x128xf32>
    %60 = arith.divf %58, %59 : vector<8x128xf32>
    %61 = vector.extract_strided_slice %43 {offsets = [0, 256], sizes = [8, 128], strides = [1, 1]} : vector<8x384xf32> to vector<8x128xf32>
    %62 = vector.extract_strided_slice %44 {offsets = [0, 256], sizes = [8, 128], strides = [1, 1]} : vector<8x384xf32> to vector<8x128xf32>
    %63 = vector.broadcast %3 : vector<1x128xf32> to vector<8x128xf32>
    %64 = arith.addf %62, %63 : vector<8x128xf32>
    %65 = arith.mulf %52, %64 : vector<8x128xf32>
    %66 = arith.addf %61, %65 : vector<8x128xf32>
    %67 = math.tanh %66 : vector<8x128xf32>
    %cst_22 = arith.constant 1.000000e+00 : f32
    %68 = vector.broadcast %cst_22 : f32 to vector<8x128xf32>
    %69 = arith.subf %68, %60 : vector<8x128xf32>
    %70 = arith.mulf %69, %67 : vector<8x128xf32>
    %71 = arith.mulf %60, %37 : vector<8x128xf32>
    %72 = arith.addf %70, %71 : vector<8x128xf32>
    %73 = arith.index_cast %c1_i32 : i32 to index
    %c0_23 = arith.constant 0 : index
    %c0_24 = arith.constant 0 : index
    %74 = vector.load %arg7[%73, %c0_23, %c0_24] : memref<3x8x128xf32, #tpu.memory_space<vmem>>, vector<1x8x128xf32>
    %75 = vector.shape_cast %74 : vector<1x8x128xf32> to vector<8x128xf32>
    %76 = vector.shape_cast %72 : vector<8x128xf32> to vector<1x8x128xf32>
    tpu.vector_store %arg7[%73, %c0_23, %c0_24], %76 {strides = array<i32>} : memref<3x8x128xf32, #tpu.memory_space<vmem>>, vector<1x8x128xf32>,
    %c2_i32 = arith.constant 2 : i32
    %cst_25 = arith.constant dense<0.000000e+00> : vector<8x384xf32>
    %77 = tpu.matmul %72, %0, %cst_25 {dimension_numbers = #tpu.dot_dimension_numbers<[1], [0], [0], [1], [0, 0, 1, 1], [], []>} : vector<8x128xf32>, vector<128x384xf32>, vector<8x384xf32> -> vector<8x384xf32>
    %78 = vector.broadcast %2 : vector<1x384xf32> to vector<8x384xf32>
    %79 = arith.addf %77, %78 : vector<8x384xf32>
    %cst_26 = arith.constant dense<0.000000e+00> : vector<8x384xf32>
    %80 = tpu.matmul %72, %1, %cst_26 {dimension_numbers = #tpu.dot_dimension_numbers<[1], [0], [0], [1], [0, 0, 1, 1], [], []>} : vector<8x128xf32>, vector<128x384xf32>, vector<8x384xf32> -> vector<8x384xf32>
    %81 = vector.extract_strided_slice %79 {offsets = [0, 0], sizes = [8, 128], strides = [1, 1]} : vector<8x384xf32> to vector<8x128xf32>
    %82 = vector.extract_strided_slice %80 {offsets = [0, 0], sizes = [8, 128], strides = [1, 1]} : vector<8x384xf32> to vector<8x128xf32>
    %83 = arith.addf %81, %82 : vector<8x128xf32>
    %84 = arith.negf %83 : vector<8x128xf32>
    %85 = math.exp %84 : vector<8x128xf32>
    %cst_27 = arith.constant 1.000000e+00 : f32
    %86 = vector.broadcast %cst_27 : f32 to vector<8x128xf32>
    %87 = arith.addf %86, %85 : vector<8x128xf32>
    %88 = arith.divf %86, %87 : vector<8x128xf32>
    %89 = vector.extract_strided_slice %79 {offsets = [0, 128], sizes = [8, 128], strides = [1, 1]} : vector<8x384xf32> to vector<8x128xf32>
    %90 = vector.extract_strided_slice %80 {offsets = [0, 128], sizes = [8, 128], strides = [1, 1]} : vector<8x384xf32> to vector<8x128xf32>
    %91 = arith.addf %89, %90 : vector<8x128xf32>
    %92 = arith.negf %91 : vector<8x128xf32>
    %93 = math.exp %92 : vector<8x128xf32>
    %cst_28 = arith.constant 1.000000e+00 : f32
    %94 = vector.broadcast %cst_28 : f32 to vector<8x128xf32>
    %95 = arith.addf %94, %93 : vector<8x128xf32>
    %96 = arith.divf %94, %95 : vector<8x128xf32>
    %97 = vector.extract_strided_slice %79 {offsets = [0, 256], sizes = [8, 128], strides = [1, 1]} : vector<8x384xf32> to vector<8x128xf32>
    %98 = vector.extract_strided_slice %80 {offsets = [0, 256], sizes = [8, 128], strides = [1, 1]} : vector<8x384xf32> to vector<8x128xf32>
    %99 = vector.broadcast %3 : vector<1x128xf32> to vector<8x128xf32>
    %100 = arith.addf %98, %99 : vector<8x128xf32>
    %101 = arith.mulf %88, %100 : vector<8x128xf32>
    %102 = arith.addf %97, %101 : vector<8x128xf32>
    %103 = math.tanh %102 : vector<8x128xf32>
    %cst_29 = arith.constant 1.000000e+00 : f32
    %104 = vector.broadcast %cst_29 : f32 to vector<8x128xf32>
    %105 = arith.subf %104, %96 : vector<8x128xf32>
    %106 = arith.mulf %105, %103 : vector<8x128xf32>
    %107 = arith.mulf %96, %72 : vector<8x128xf32>
    %108 = arith.addf %106, %107 : vector<8x128xf32>
    %109 = arith.index_cast %c2_i32 : i32 to index
    %c0_30 = arith.constant 0 : index
    %c0_31 = arith.constant 0 : index
    %110 = vector.load %arg7[%109, %c0_30, %c0_31] : memref<3x8x128xf32, #tpu.memory_space<vmem>>, vector<1x8x128xf32>
    %111 = vector.shape_cast %110 : vector<1x8x128xf32> to vector<8x128xf32>
    %112 = vector.shape_cast %108 : vector<8x128xf32> to vector<1x8x128xf32>
    tpu.vector_store %arg7[%109, %c0_30, %c0_31], %112 {strides = array<i32>} : memref<3x8x128xf32, #tpu.memory_space<vmem>>, vector<1x8x128xf32>,
    %c2_i32_32 = arith.constant 2 : i32
    return
  }
  func.func @transform_0(%arg0: i32) -> (i32, i32) {
    %c0_i32 = arith.constant 0 : i32
    %c0_i32_0 = arith.constant 0 : i32
    %c0_i32_1 = arith.constant 0 : i32
    return %c0_i32, %c0_i32_0 : i32, i32
  }
  func.func @transform_1(%arg0: i32) -> (i32, i32) {
    %c0_i32 = arith.constant 0 : i32
    %c0_i32_0 = arith.constant 0 : i32
    %c0_i32_1 = arith.constant 0 : i32
    return %c0_i32, %c0_i32_0 : i32, i32
  }
  func.func @transform_2(%arg0: i32) -> (i32, i32) {
    %c0_i32 = arith.constant 0 : i32
    %c0_i32_0 = arith.constant 0 : i32
    %c0_i32_1 = arith.constant 0 : i32
    return %c0_i32, %c0_i32_0 : i32, i32
  }
  func.func @transform_3(%arg0: i32) -> (i32, i32) {
    %c0_i32 = arith.constant 0 : i32
    %c0_i32_0 = arith.constant 0 : i32
    %c0_i32_1 = arith.constant 0 : i32
    return %c0_i32, %c0_i32_0 : i32, i32
  }
  func.func @transform_4(%arg0: i32) -> (i32, i32) {
    %c0_i32 = arith.constant 0 : i32
    %c0_i32_0 = arith.constant 0 : i32
    %c0_i32_1 = arith.constant 0 : i32
    return %c0_i32, %c0_i32_0 : i32, i32
  }
  func.func @transform_5(%arg0: i32) -> (i32, i32) {
    %c0_i32 = arith.constant 0 : i32
    %c0_i32_0 = arith.constant 0 : i32
    %c0_i32_1 = arith.constant 0 : i32
    return %c0_i32, %c0_i32_0 : i32, i32
  }
  func.func @transform_6(%arg0: i32) -> (i32, i32, i32) {
    %c0_i32 = arith.constant 0 : i32
    %c0_i32_0 = arith.constant 0 : i32
    %c0_i32_1 = arith.constant 0 : i32
    %c0_i32_2 = arith.constant 0 : i32
    return %c0_i32, %c0_i32_0, %c0_i32_1 : i32, i32, i32
  }
}

</mosaic_0001>

<bundles_post_ra>
// kernel: tpu_custom_call.1
= control target key start
LH: loop header
LB: loop body
LE: loop exit
PB: predicated region body
PF: predicated region fallthrough
CT: control target
= control target key end

     0   :  { %11 = vsyncpa [#allocation3], 0  ;;  %s2420_s0 = inlined_call_operand.hbm [shape: f32[8,128], index: 0, kind: input, shape index: {}]   ;;  %s2421_s1 = inlined_call_operand.hbm [shape: f32[8,128], index: 1, kind: input, shape index: {}]   ;;  %s2422_s2 = inlined_call_operand.hbm [shape: f32[128,384], index: 2, kind: input, shape index: {}]   ;;  %s2423_s3 = inlined_call_operand.hbm [shape: f32[128,384], index: 3, kind: input, shape index: {}]   ;;  %s2424_s4 = inlined_call_operand.vmem [shape: f32[1,384], index: 4, kind: input, shape index: {}]   ;;  %s2425_s5 = inlined_call_operand.vmem [shape: f32[1,128], index: 5, kind: input, shape index: {}]   ;;  %s2426_s6 = inlined_call_operand.hbm [shape: f32[3,8,128], index: 6, kind: output, shape index: {}]  }
   0x1   :  { %12 = vsyncpa [#allocation6], 0 }
   0x2   :  { %13 = vsyncpa [#allocation9], 0 }
   0x3   :  { %14 = vsyncpa [#allocation4], 0  ;;  %s1960_s21 = smov [#allocation5]   ;;  %s1961_s23 = smov [#allocation2]  }
   0x4   :  { %s31_s22 = sshll.u32 %s1960_s21, 4  ;;  %s21_s24 = sshll.u32 %s1961_s23, 4  ;;  %s32_s22 = int_to_ptr.vmem [resolvable:$true] %s31_s22  ;;  %s22_s24 = int_to_ptr.vmem [resolvable:$true] %s21_s24 }
   0x5   :  { %s1842_s27 = scalar_lea.hbm %s2421_s1, 128 }
   0x6   :  { %p1843_p0 = scmp.ne.s32.totalorder %s2421_s1, %s1842_s27  ;;  %p1846_p1 = scmp.lt.u32.totalorder %s1842_s27, %s2421_s1 }
   0x8   :  { %p1848_p2 = pnand %p1846_p1, %p1843_p0 }
   0xa   :  { %1851 = shalt.err (!%p1848_p2)
}
   0xb   :  { %s1852_s8 = scalar_lea.vmem %s32_s22, 128  ;;  %p1857_p4 = scmp.lt.s32.totalorder %s32_s22, %s32_s22 }
   0xc   :  { %p1853_p3 = scmp.ne.s32.totalorder %s32_s22, %s1852_s8  ;;  %p1858_p5 = scmp.lt.s32.totalorder %s1852_s8, %s1852_s8 }
   0xe   :  { %p1859_p6 = por %p1858_p5, %p1857_p4 }
  0x10   :  { %p1860_p7 = pnand %p1859_p6, %p1853_p3 }
  0x12   :  { %1863 = shalt.err (!%p1860_p7)
}
  0x13   :  { %34 = dma.hbm_to_vmem [thread:$0]  %s2421_s1, 128, %s32_s22, [#allocation6]  }
  0x14   :  { %s1864_s13 = scalar_lea.hbm %s2420_s0, 128 }
  0x15   :  { %p1865_p8 = scmp.ne.s32.totalorder %s2420_s0, %s1864_s13  ;;  %p1868_p9 = scmp.lt.u32.totalorder %s1864_s13, %s2420_s0 }
  0x17   :  { %p1870_p10 = pnand %p1868_p9, %p1865_p8 }
  0x19   :  { %1873 = shalt.err (!%p1870_p10)
}
  0x1a   :  { %s1874_s18 = scalar_lea.vmem %s22_s24, 128  ;;  %p1879_p12 = scmp.lt.s32.totalorder %s22_s24, %s22_s24 }
  0x1b   :  { %p1875_p11 = scmp.ne.s32.totalorder %s22_s24, %s1874_s18  ;;  %p1880_p13 = scmp.lt.s32.totalorder %s1874_s18, %s1874_s18 }
  0x1d   :  { %p1881_p0 = por %p1880_p13, %p1879_p12 }
  0x1f   :  { %p1882_p1 = pnand %p1881_p0, %p1875_p11 }
  0x21   :  { %1885 = shalt.err (!%p1882_p1)
}
  0x22   :  { %24 = dma.hbm_to_vmem [thread:$0]  %s2420_s0, 128, %s22_s24, [#allocation3]  }
  0x23   :  { %s1962_s20 = smov [#allocation7]   ;;  %s1886_s25 = scalar_lea.hbm %s2422_s2, 6144 }
  0x24   :  { %s40_s21 = sshll.u32 %s1962_s20, 4  ;;  %p1887_p2 = scmp.ne.s32.totalorder %s2422_s2, %s1886_s25  ;;  %s41_s21 = int_to_ptr.vmem [resolvable:$true] %s40_s21 }
  0x25   :  { %p1890_p3 = scmp.lt.u32.totalorder %s1886_s25, %s2422_s2 }
  0x27   :  { %p1892_p4 = pnand %p1890_p3, %p1887_p2 }
  0x29   :  { %1895 = shalt.err (!%p1892_p4)
}
  0x2a   :  { %s1896_s30 = scalar_lea.vmem %s41_s21, 6144  ;;  %p1901_p6 = scmp.lt.s32.totalorder %s41_s21, %s41_s21 }
  0x2b   :  { %p1897_p5 = scmp.ne.s32.totalorder %s41_s21, %s1896_s30  ;;  %p1902_p7 = scmp.lt.s32.totalorder %s1896_s30, %s1896_s30 }
  0x2d   :  { %p1903_p8 = por %p1902_p7, %p1901_p6 }
  0x2f   :  { %p1904_p9 = pnand %p1903_p8, %p1897_p5 }
  0x31   :  { %1907 = shalt.err (!%p1904_p9)
}
  0x32   :  { %s1963_s0 = smov 384   ;;  %s1964_s24 = smov 24  }
  0x33   :  { %46 = dma.hbm_to_vmem [thread:$0]  %s2422_s2, 6144, %s41_s21, [#allocation6], %s1963_s0, %s1963_s0, %s1964_s24  }
  0x34   :  { %s1965_s9 = smov [#allocation8]   ;;  %s1908_s13 = scalar_lea.hbm %s2423_s3, 6144 }
  0x35   :  { %s52_s10 = sshll.u32 %s1965_s9, 4  ;;  %p1909_p10 = scmp.ne.s32.totalorder %s2423_s3, %s1908_s13  ;;  %s53_s10 = int_to_ptr.vmem [resolvable:$true] %s52_s10 }
  0x36   :  { %p1912_p11 = scmp.lt.u32.totalorder %s1908_s13, %s2423_s3 }
  0x38   :  { %p1914_p12 = pnand %p1912_p11, %p1909_p10 }
  0x3a   :  { %1917 = shalt.err (!%p1914_p12)
}
  0x3b   :  { %s1918_s18 = scalar_lea.vmem %s53_s10, 6144  ;;  %p1923_p0 = scmp.lt.s32.totalorder %s53_s10, %s53_s10 }
  0x3c   :  { %p1919_p13 = scmp.ne.s32.totalorder %s53_s10, %s1918_s18  ;;  %p1924_p1 = scmp.lt.s32.totalorder %s1918_s18, %s1918_s18 }
  0x3e   :  { %p1925_p2 = por %p1924_p1, %p1923_p0 }
  0x40   :  { %p1926_p3 = pnand %p1925_p2, %p1919_p13 }
  0x42   :  { %1929 = shalt.err (!%p1926_p3)
}
  0x43   :  { %58 = dma.hbm_to_vmem [thread:$0]  %s2423_s3, 6144, %s53_s10, [#allocation9], %s1963_s0, %s1963_s0, %s1964_s24  }
  0x44   :  { %1952 = dma.done.wait [#allocation3], 128  }
  0x45   :  { %1953 = vsyncadd [#allocation3], 4294967168 }
  0x46   :  { %1954 = dma.done.wait [#allocation6], 6272  }
  0x47   :  { %1955 = vsyncadd [#allocation6], 4294961024 }
  0x48   :  { %1956 = dma.done.wait [#allocation9], 6144  }
  0x49   :  { %1957 = vsyncadd [#allocation9], 4294961152  ;;  %v2429_v0 = vmov 0.0|0.0   ;;  %v2427_v1 = vmov 0.0   ;;  %vm1968_vm0 = vmmov 0   ;;  %v76_v2 = vld [vmem:[#allocation7 + $0x8] sm:$0xff] }
  0x4a   :  { %1484 = vmatprep.subr.bf16.mxu1 %v2429_v0  ;;  %255 = vmatprep.mubr.f32.mxu0 %v2427_v1  ;;  %v79_v3 = vld [vmem:[#allocation7 + $0x20] sm:$0xff]  ;;  %v78_v6 = vld [vmem:[#allocation7 + $0x18] sm:$0xff]  ;;  %v85_v8 = vld [vmem:[#allocation7 + $0x50] sm:$0xff] }
  0x4b   :  { %1274 = vmatprep.mubr.msk.f32.mxu1 %vm1968_vm0, %v2427_v1  ;;  %v75_v4 = vld [vmem:[#allocation7] sm:$0xff]  ;;  %v2059_v5 = vpack.c.bf16 %v79_v3, %v76_v2  ;;  %v82_v7 = vld [vmem:[#allocation7 + $0x38] sm:$0xff]  ;;  %v81_v11 = vld [vmem:[#allocation7 + $0x30] sm:$0xff] }
  0x4c   :  { %v2061_v9 = vpack.c.bf16 %v78_v6, %v75_v4  ;;  %v2063_v10 = vpack.c.bf16 %v85_v8, %v82_v7  ;;  %v84_v12 = vld [vmem:[#allocation7 + $0x48] sm:$0xff]  ;;  %v91_v14 = vld [vmem:[#allocation7 + $0x80] sm:$0xff]  ;;  %v90_v18 = vld [vmem:[#allocation7 + $0x78] sm:$0xff] }
  0x4d   :  { %v88_v13 = vld [vmem:[#allocation7 + $0x68] sm:$0xff]  ;;  %1453 = vmatprep.subr.bf16.mxu0 %v2059_v5  ;;  %v2067_v15 = vpack.c.bf16 %v84_v12, %v81_v11  ;;  %v87_v17 = vld [vmem:[#allocation7 + $0x60] sm:$0xff]  ;;  %v94_v19 = vld [vmem:[#allocation7 + $0x98] sm:$0xff] }
  0x4e   :  { %1455 = vmatpush1.bf16.msra.mxu0 %v2061_v9  ;;  %v2070_v16 = vpack.c.bf16 %v91_v14, %v88_v13  ;;  %v97_v20 = vld [vmem:[#allocation7 + $0xb0] sm:$0xff]  ;;  %v2073_v21 = vpack.c.bf16 %v90_v18, %v87_v17  ;;  %v96_v24 = vld [vmem:[#allocation7 + $0xa8] sm:$0xff]  ;;  %v103_v28 = vld [vmem:[#allocation7 + $0xe0] sm:$0xff] }
  0x4f   :  { %1457 = vmatprep.subr.bf16.mxu0 %v2063_v10  ;;  %v93_v22 = vld [vmem:[#allocation7 + $0x90] sm:$0xff]  ;;  %v2076_v23 = vpack.c.bf16 %v97_v20, %v94_v19  ;;  %v80_v26 = vld [vmem:[#allocation7 + $0x28] sm:$0xff]  ;;  %v83_v30 = vld [vmem:[#allocation7 + $0x40] sm:$0xff] }
  0x50   :  { %v77_v25 = vld [vmem:[#allocation7 + $0x10] sm:$0xff]  ;;  %v100_v27 = vld [vmem:[#allocation7 + $0xc8] sm:$0xff]  ;;  %v86_v31 = vld [vmem:[#allocation7 + $0x58] sm:$0xff]  ;;  %v2081_v32 = vpack.c.bf16 %v96_v24, %v93_v22 }
  0x51   :  { %v2078_v29 = vpack.c.bf16 %v80_v26, %v77_v25  ;;  %v2084_v33 = vpack.c.bf16 %v86_v31, %v83_v30  ;;  %v2087_v34 = vpack.c.bf16 %v103_v28, %v100_v27  ;;  %v99_v35 = vld [vmem:[#allocation7 + $0xc0] sm:$0xff]  ;;  %v102_v36 = vld [vmem:[#allocation7 + $0xd8] sm:$0xff]  ;;  %v89_v37 = vld [vmem:[#allocation7 + $0x70] sm:$0xff] }
  0x52   :  { %1459 = vmatpush1.bf16.msra.mxu0 %v2067_v15  ;;  %v106_v38 = vld [vmem:[#allocation7 + $0xf8] sm:$0xff]  ;;  %v109_v39 = vld [vmem:[#allocation7 + $0x110] sm:$0xff]  ;;  %v92_v40 = vld [vmem:[#allocation7 + $0x88] sm:$0xff]  ;;  %v2091_v41 = vpack.c.bf16 %v102_v36, %v99_v35 }
  0x53   :  { %1461 = vmatprep.subr.bf16.mxu0 %v2070_v16  ;;  %1486 = vmatpush3.bf16.msra.mxu1 %v2078_v29  ;;  %v105_v42 = vld [vmem:[#allocation7 + $0xf0] sm:$0xff]  ;;  %v2094_v43 = vpack.c.bf16 %v92_v40, %v89_v37  ;;  %v2097_v44 = vpack.c.bf16 %v109_v39, %v106_v38  ;;  %v108_v45 = vld [vmem:[#allocation7 + $0x108] sm:$0xff]  ;;  %v95_v46 = vld [vmem:[#allocation7 + $0xa0] sm:$0xff] }
  0x54   :  { %1487 = vmatprep.subr.bf16.mxu1 %v2429_v0  ;;  %v98_v47 = vld [vmem:[#allocation7 + $0xb8] sm:$0xff]  ;;  %v112_v48 = vld [vmem:[#allocation7 + $0x128] sm:$0xff]  ;;  %v115_v49 = vld [vmem:[#allocation7 + $0x140] sm:$0xff]  ;;  %v2101_v50 = vpack.c.bf16 %v108_v45, %v105_v42 }
  0x55   :  { %v111_v51 = vld [vmem:[#allocation7 + $0x120] sm:$0xff]  ;;  %v2104_v52 = vpack.c.bf16 %v98_v47, %v95_v46  ;;  %v2107_v53 = vpack.c.bf16 %v115_v49, %v112_v48  ;;  %v114_v54 = vld [vmem:[#allocation7 + $0x138] sm:$0xff]  ;;  %v101_v55 = vld [vmem:[#allocation7 + $0xd0] sm:$0xff] }
  0x56   :  { %1463 = vmatpush1.bf16.msra.mxu0 %v2073_v21  ;;  %v104_v56 = vld [vmem:[#allocation7 + $0xe8] sm:$0xff]  ;;  %v118_v57 = vld [vmem:[#allocation7 + $0x158] sm:$0xff]  ;;  %v121_v58 = vld [vmem:[#allocation7 + $0x170] sm:$0xff]  ;;  %v2111_v59 = vpack.c.bf16 %v114_v54, %v111_v51 }
  0x57   :  { %1465 = vmatprep.subr.bf16.mxu0 %v2076_v23  ;;  %1489 = vmatpush3.bf16.msra.mxu1 %v2084_v33  ;;  %v117_v60 = vld [vmem:[#allocation7 + $0x150] sm:$0xff]  ;;  %v2114_v61 = vpack.c.bf16 %v104_v56, %v101_v55  ;;  %v2117_v62 = vpack.c.bf16 %v121_v58, %v118_v57  ;;  %v120_v63 = vld [vmem:[#allocation7 + $0x168] sm:$0xff]  ;;  %v107_v2 = vld [vmem:[#allocation7 + $0x100] sm:$0xff] }
  0x58   :  { %1490 = vmatprep.subr.bf16.mxu1 %v2429_v0  ;;  %v110_v3 = vld [vmem:[#allocation7 + $0x118] sm:$0xff]  ;;  %v124_v4 = vld [vmem:[#allocation8 + $0x8] sm:$0xff]  ;;  %v127_v6 = vld [vmem:[#allocation8 + $0x20] sm:$0xff]  ;;  %v2121_v7 = vpack.c.bf16 %v120_v63, %v117_v60 }
  0x59   :  { %2439 = vst [vmem:[#allocation15_spill] sm:$0xff] %v2117_v62  ;;  %v123_v8 = vld [vmem:[#allocation8] sm:$0xff]  ;;  %v2124_v11 = vpack.c.bf16 %v110_v3, %v107_v2  ;;  %v2127_v12 = vpack.c.bf16 %v127_v6, %v124_v4  ;;  %v126_v13 = vld [vmem:[#allocation8 + $0x18] sm:$0xff]  ;;  %v113_v14 = vld [vmem:[#allocation7 + $0x130] sm:$0xff] }
  0x5a   :  { %1467 = vmatpush1.bf16.msra.mxu0 %v2081_v32  ;;  %2440 = vst [vmem:[#allocation16_spill] sm:$0xff] %v2121_v7  ;;  %v116_v17 = vld [vmem:[#allocation7 + $0x148] sm:$0xff]  ;;  %v130_v18 = vld [vmem:[#allocation8 + $0x38] sm:$0xff]  ;;  %v133_v19 = vld [vmem:[#allocation8 + $0x50] sm:$0xff]  ;;  %v2131_v22 = vpack.c.bf16 %v126_v13, %v123_v8 }
  0x5b   :  { %1469 = vmatprep.subr.bf16.mxu0 %v2087_v34  ;;  %1492 = vmatpush3.bf16.msra.mxu1 %v2094_v43  ;;  %2441 = vst [vmem:[#allocation17_spill] sm:$0xff] %v2127_v12  ;;  %v173_v20 = vld [vmem:[#allocation2] sm:$0xff]  ;;  %v2134_v25 = vpack.c.bf16 %v116_v17, %v113_v14  ;;  %v2137_v26 = vpack.c.bf16 %v133_v19, %v130_v18  ;;  %v132_v27 = vld [vmem:[#allocation8 + $0x48] sm:$0xff]  ;;  %v119_v28 = vld [vmem:[#allocation7 + $0x160] sm:$0xff] }
  0x5c   :  { %1493 = vmatprep.subr.bf16.mxu1 %v2429_v0  ;;  %v129_v24 = vld [vmem:[#allocation8 + $0x30] sm:$0xff]  ;;  %v122_v30 = vld [vmem:[#allocation7 + $0x178] sm:$0xff]  ;;  %v136_v31 = vld [vmem:[#allocation8 + $0x68] sm:$0xff] }
  0x5d   :  { %v139_v35 = vld [vmem:[#allocation8 + $0x80] sm:$0xff]  ;;  %v2141_v36 = vpack.c.bf16 %v132_v27, %v129_v24  ;;  %v2144_v38 = vpack.c.bf16 %v122_v30, %v119_v28  ;;  %v138_v40 = vld [vmem:[#allocation8 + $0x78] sm:$0xff]  ;;  %v125_v42 = vld [vmem:[#allocation8 + $0x10] sm:$0xff] }
  0x5e   :  { %1471 = vmatpush1.bf16.msra.mxu0 %v2091_v41  ;;  %v135_v37 = vld [vmem:[#allocation8 + $0x60] sm:$0xff]  ;;  %v2147_v39 = vpack.c.bf16 %v139_v35, %v136_v31  ;;  %v128_v45 = vld [vmem:[#allocation8 + $0x28] sm:$0xff]  ;;  %v142_v46 = vld [vmem:[#allocation8 + $0x98] sm:$0xff] }
  0x5f   :  { %1473 = vmatprep.subr.bf16.mxu0 %v2097_v44  ;;  %1495 = vmatpush3.bf16.msra.mxu1 %v2104_v52  ;;  %2442 = vst [vmem:[#allocation18_spill] sm:$0xff] %v2144_v38  ;;  %v145_v47 = vld [vmem:[#allocation8 + $0xb0] sm:$0xff]  ;;  %v2152_v48 = vpack.c.bf16 %v138_v40, %v135_v37  ;;  %v2155_v51 = vpack.c.bf16 %v128_v45, %v125_v42  ;;  %v144_v55 = vld [vmem:[#allocation8 + $0xa8] sm:$0xff]  ;;  %v131_v56 = vld [vmem:[#allocation8 + $0x40] sm:$0xff] }
  0x60   :  { %1496 = vmatprep.subr.bf16.mxu1 %v2429_v0  ;;  %v141_v49 = vld [vmem:[#allocation8 + $0x90] sm:$0xff]  ;;  %v2158_v54 = vpack.c.bf16 %v145_v47, %v142_v46  ;;  %v134_v57 = vld [vmem:[#allocation8 + $0x58] sm:$0xff]  ;;  %v148_v58 = vld [vmem:[#allocation8 + $0xc8] sm:$0xff] }
  0x61   :  { %v151_v60 = vld [vmem:[#allocation8 + $0xe0] sm:$0xff]  ;;  %v2162_v63 = vpack.c.bf16 %v144_v55, %v141_v49  ;;  %v2165_v3 = vpack.c.bf16 %v134_v57, %v131_v56  ;;  %v150_v6 = vld [vmem:[#allocation8 + $0xd8] sm:$0xff]  ;;  %v137_v8 = vld [vmem:[#allocation8 + $0x70] sm:$0xff] }
  0x62   :  { %1475 = vmatpush1.bf16.msra.mxu0 %v2101_v50  ;;  %v147_v2 = vld [vmem:[#allocation8 + $0xc0] sm:$0xff]  ;;  %v2168_v4 = vpack.c.bf16 %v151_v60, %v148_v58  ;;  %v140_v13 = vld [vmem:[#allocation8 + $0x88] sm:$0xff]  ;;  %v154_v14 = vld [vmem:[#allocation8 + $0xf8] sm:$0xff] }
  0x63   :  { %1477 = vmatprep.subr.bf16.mxu0 %v2107_v53  ;;  %1498 = vmatpush3.bf16.msra.mxu1 %v2114_v61  ;;  %v157_v17 = vld [vmem:[#allocation8 + $0x110] sm:$0xff]  ;;  %v2174_v18 = vpack.c.bf16 %v150_v6, %v147_v2  ;;  %v156_v27 = vld [vmem:[#allocation8 + $0x108] sm:$0xff]  ;;  %v143_v28 = vld [vmem:[#allocation8 + $0xa0] sm:$0xff] }
  0x64   :  { %1499 = vmatprep.subr.bf16.mxu1 %v2429_v0  ;;  %v153_v19 = vld [vmem:[#allocation8 + $0xf0] sm:$0xff]  ;;  %v2180_v24 = vpack.c.bf16 %v157_v17, %v154_v14  ;;  %v146_v30 = vld [vmem:[#allocation8 + $0xb8] sm:$0xff]  ;;  %v160_v31 = vld [vmem:[#allocation8 + $0x128] sm:$0xff] }
  0x65   :  { %v163_v35 = vld [vmem:[#allocation8 + $0x140] sm:$0xff]  ;;  %v2184_v37 = vpack.c.bf16 %v156_v27, %v153_v19  ;;  %v2187_v42 = vpack.c.bf16 %v146_v30, %v143_v28  ;;  %v162_v46 = vld [vmem:[#allocation8 + $0x138] sm:$0xff]  ;;  %v149_v47 = vld [vmem:[#allocation8 + $0xd0] sm:$0xff] }
  0x66   :  { %1479 = vmatpush1.bf16.msra.mxu0 %v2111_v59  ;;  %v159_v40 = vld [vmem:[#allocation8 + $0x120] sm:$0xff]  ;;  %v2190_v45 = vpack.c.bf16 %v163_v35, %v160_v31  ;;  %v152_v49 = vld [vmem:[#allocation8 + $0xe8] sm:$0xff]  ;;  %v166_v55 = vld [vmem:[#allocation8 + $0x158] sm:$0xff] }
  0x67   :  { %1481 = vmatprep.subr.bf16.mxu0 %v2117_v62  ;;  %1501 = vmatpush3.bf16.msra.mxu1 %v2124_v11  ;;  %v169_v56 = vld [vmem:[#allocation8 + $0x170] sm:$0xff]  ;;  %v2194_v57 = vpack.c.bf16 %v162_v46, %v159_v40  ;;  %v2197_v60 = vpack.c.bf16 %v152_v49, %v149_v47  ;;  %v168_v6 = vld [vmem:[#allocation8 + $0x168] sm:$0xff]  ;;  %v2212_v28 = vld [vmem:[#allocation5] sm:$0xff]  ;;  %v176_v49 = vlaneseq }
  0x68   :  { %1502 = vmatprep.subr.bf16.mxu1 %v2429_v0  ;;  %v165_v58 = vld [vmem:[#allocation8 + $0x150] sm:$0xff]  ;;  %v2200_v2 = vpack.c.bf16 %v169_v56, %v166_v55  ;;  %v164_v27 = vld [vmem:[#allocation8 + $0x148] sm:$0xff]  ;;  %v167_v31 = vld [vmem:[#allocation8 + $0x160] sm:$0xff] }
  0x69   :  { %v2204_v14 = vpack.c.bf16 %v168_v6, %v165_v58  ;;  %v161_v19 = vld [vmem:[#allocation8 + $0x130] sm:$0xff]  ;;  %v170_v35 = vld [vmem:[#allocation8 + $0x178] sm:$0xff]  ;;  %v177_v55 = vshrl.u32 %v176_v49, 7 }
  0x6a   :  { %1483 = vmatpush1.bf16.msra.mxu0 %v2121_v7  ;;  %v2215_v30 = vpack.c.bf16 %v164_v27, %v161_v19  ;;  %v2221_v40 = vpack.c.bf16 %v170_v35, %v167_v31  ;;  %v171_v58 = vld [vmem:[%s2424_s4] sm:$0x7] }
  0x6b   :  { %1509 = vmatprep.subr.bf16.mxu0 %v2127_v12  ;;  %1504 = vmatpush3.bf16.msra.mxu1 %v2134_v25  ;;  %v178_v56 = vsub.s32 0, %v177_v55  ;;  %v182_v6 = vsub.s32 1, %v177_v55 }
  0x6c   :  { %1505 = vmatprep.subr.bf16.mxu1 %v2429_v0 }
  0x6d   :  { %256 = vmatmul.mubr.f32.vlgmr.msra.gmra.mrb[0].mxu0 %v173_v20  ;;  %v2267_v19 = vrot.slane %v171_v58, %v182_v6  ;;  %v2274_v6 = vld [vmem:[%s2425_s5] ss:$0 sm:$0xff]  ;;  %s1969_s5 = smov [#allocation10]  }
  0x6e   :  { %1511 = vmatpush1.bf16.msra.mxu0 %v2131_v22  ;;  %396 = vmatprep.mubr.f32.mxu0 %v2427_v1  ;;  %s1119_s21 = sshll.u32 %s1969_s5, 4  ;;  %s1120_s21 = int_to_ptr.vmem [resolvable:$true] %s1119_s21 }
  0x6f   :  { %1513 = vmatprep.subr.bf16.mxu0 %v2137_v26  ;;  %1507 = vmatpush3.bf16.msra.mxu1 %v2144_v38  ;;  %2444 = vst [vmem:[#allocation20_spill] sm:$0xff] %v2267_v19  ;;  %s1930_s22 = scalar_lea.vmem %s1120_s21, 384  ;;  %p1935_p5 = scmp.lt.s32.totalorder %s1120_s21, %s1120_s21 }
  0x70   :  { %1540 = vmatprep.subr.bf16.mxu1 %v2429_v0  ;;  %p1931_p4 = scmp.ne.s32.totalorder %s1120_s21, %s1930_s22  ;;  %p1936_p6 = scmp.lt.s32.totalorder %s1930_s22, %s1930_s22 }
  0x72   :  { %1515 = vmatpush1.bf16.msra.mxu0 %v2141_v36  ;;  %1275 = vmatmul.mubr.f32.vlgmr.msra.gmra.mrb[0].mxu1 %v173_v20  ;;  %v2177_v20 = vpack.c.bf16 %v140_v13, %v137_v8  ;;  %v155_v8 = vld [vmem:[#allocation8 + $0x100] sm:$0xff]  ;;  %v158_v13 = vld [vmem:[#allocation8 + $0x118] sm:$0xff]  ;;  %p1937_p7 = por %p1936_p6, %p1935_p5 }
  0x73   :  { %1517 = vmatprep.subr.bf16.mxu0 %v2147_v39  ;;  %1542 = vmatpush3.bf16.msra.mxu1 %v2155_v51  ;;  %v2207_v17 = vpack.c.bf16 %v158_v13, %v155_v8  ;;  %v2265_v8 = vrot.slane %v171_v58, %v178_v56 }
  0x74   :  { %1543 = vmatprep.subr.bf16.mxu1 %v2429_v0  ;;  %1309 = vmatprep.mubr.msk.f32.mxu1 %vm1968_vm0, %v2427_v1  ;;  %p1938_p8 = pnand %p1937_p7, %p1931_p4 }
  0x75   :  { %2443 = vst [vmem:[#allocation19_spill] sm:$0xff] %v2265_v8 }
  0x76   :  { %1519 = vmatpush1.bf16.msra.mxu0 %v2152_v48 }
  0x77   :  { %1521 = vmatprep.subr.bf16.mxu0 %v2158_v54  ;;  %1545 = vmatpush3.bf16.msra.mxu1 %v2165_v3 }
  0x78   :  { %1546 = vmatprep.subr.bf16.mxu1 %v2429_v0 }
  0x7a   :  { %1523 = vmatpush1.bf16.msra.mxu0 %v2162_v63 }
  0x7b   :  { %1525 = vmatprep.subr.bf16.mxu0 %v2168_v4  ;;  %1548 = vmatpush3.bf16.msra.mxu1 %v2177_v20 }
  0x7c   :  { %1549 = vmatprep.subr.bf16.mxu1 %v2429_v0 }
  0x7e   :  { %1527 = vmatpush1.bf16.msra.mxu0 %v2174_v18 }
  0x7f   :  { %1529 = vmatprep.subr.bf16.mxu0 %v2180_v24  ;;  %1551 = vmatpush3.bf16.msra.mxu1 %v2187_v42 }
  0x80   :  { %1552 = vmatprep.subr.bf16.mxu1 %v2429_v0 }
  0x82   :  { %1531 = vmatpush1.bf16.msra.mxu0 %v2184_v37 }
  0x83   :  { %1533 = vmatprep.subr.bf16.mxu0 %v2190_v45  ;;  %1554 = vmatpush3.bf16.msra.mxu1 %v2197_v60 }
  0x84   :  { %1555 = vmatprep.subr.bf16.mxu1 %v2429_v0 }
  0x86   :  { %1535 = vmatpush1.bf16.msra.mxu0 %v2194_v57 }
  0x87   :  { %1537 = vmatprep.subr.bf16.mxu0 %v2200_v2  ;;  %1557 = vmatpush3.bf16.msra.mxu1 %v2207_v17 }
  0x88   :  { %1558 = vmatprep.subr.bf16.mxu1 %v2429_v0 }
  0x8a   :  { %1539 = vmatpush1.bf16.msra.mxu0 %v2204_v14 }
  0x8b   :  { %1565 = vmatprep.subr.bf16.mxu0 %v2059_v5  ;;  %1560 = vmatpush3.bf16.msra.mxu1 %v2215_v30 }
  0x8c   :  { %1561 = vmatprep.subr.bf16.mxu1 %v2429_v0 }
  0x8d   :  { %397 = vmatmul.mubr.f32.vlgmr.msra.gmra.mrb[0].mxu0 %v2212_v28 }
  0x8e   :  { %1567 = vmatpush1.bf16.msra.mxu0 %v2061_v9  ;;  %566 = vmatprep.mubr.f32.mxu0 %v2427_v1 }
  0x8f   :  { %1569 = vmatprep.subr.bf16.mxu0 %v2063_v10  ;;  %1563 = vmatpush3.bf16.msra.mxu1 %v2221_v40 }
  0x90   :  { %1596 = vmatprep.subr.bf16.mxu1 %v2429_v0 }
  0x92   :  { %1571 = vmatpush1.bf16.msra.mxu0 %v2067_v15  ;;  %1310 = vmatmul.mubr.f32.vlgmr.msra.gmra.mrb[2].mxu1 %v2212_v28 }
  0x93   :  { %1573 = vmatprep.subr.bf16.mxu0 %v2070_v16  ;;  %1598 = vmatpush3.bf16.msra.mxu1 %v2078_v29 }
  0x94   :  { %1599 = vmatprep.subr.bf16.mxu1 %v2429_v0  ;;  %1344 = vmatprep.mubr.msk.f32.mxu1 %vm1968_vm0, %v2427_v1 }
  0x96   :  { %1575 = vmatpush1.bf16.msra.mxu0 %v2073_v21 }
  0x97   :  { %1577 = vmatprep.subr.bf16.mxu0 %v2076_v23  ;;  %1601 = vmatpush3.bf16.msra.mxu1 %v2084_v33 }
  0x98   :  { %1602 = vmatprep.subr.bf16.mxu1 %v2429_v0 }
  0x9a   :  { %1579 = vmatpush1.bf16.msra.mxu0 %v2081_v32 }
  0x9b   :  { %1581 = vmatprep.subr.bf16.mxu0 %v2087_v34  ;;  %1604 = vmatpush3.bf16.msra.mxu1 %v2094_v43 }
  0x9c   :  { %1605 = vmatprep.subr.bf16.mxu1 %v2429_v0 }
  0x9e   :  { %1583 = vmatpush1.bf16.msra.mxu0 %v2091_v41 }
  0x9f   :  { %1585 = vmatprep.subr.bf16.mxu0 %v2097_v44  ;;  %1607 = vmatpush3.bf16.msra.mxu1 %v2104_v52 }
  0xa0   :  { %1608 = vmatprep.subr.bf16.mxu1 %v2429_v0 }
  0xa2   :  { %1587 = vmatpush1.bf16.msra.mxu0 %v2101_v50 }
  0xa3   :  { %1589 = vmatprep.subr.bf16.mxu0 %v2107_v53  ;;  %1610 = vmatpush3.bf16.msra.mxu1 %v2114_v61 }
  0xa4   :  { %1611 = vmatprep.subr.bf16.mxu1 %v2429_v0 }
  0xa6   :  { %1591 = vmatpush1.bf16.msra.mxu0 %v2111_v59 }
  0xa7   :  { %1593 = vmatprep.subr.bf16.mxu0 %v2117_v62  ;;  %1613 = vmatpush3.bf16.msra.mxu1 %v2124_v11 }
  0xa8   :  { %1614 = vmatprep.subr.bf16.mxu1 %v2429_v0 }
  0xaa   :  { %1595 = vmatpush1.bf16.msra.mxu0 %v2121_v7  ;;  %v186_v7 = vsub.s32 2, %v177_v55 }
  0xab   :  { %1621 = vmatprep.subr.bf16.mxu0 %v2127_v12  ;;  %1616 = vmatpush3.bf16.msra.mxu1 %v2134_v25 }
  0xac   :  { %1617 = vmatprep.subr.bf16.mxu1 %v2429_v0 }
  0xaf   :  { %1619 = vmatpush3.bf16.msra.mxu1 %v2144_v38 }
  0xb0   :  { %1652 = vmatprep.subr.bf16.mxu1 %v2429_v0 }
 0x145   :  { %v328_v46 = vpop.f32.mrb[0].mxu1 }
 0x146   :  { %v1276_v47 = vpop.f32.mrb[1].mxu1 }
 0x160   :  { %v398_v13 = vpop.f32.mrb[0].mxu0 }
 0x161   :  { %v1788_v27 = vadd.f32 %v398_v13, %v2265_v8  ;;  %v400_v31 = vpop.f32.mrb[1].mxu0  ;;  %v2276_v13 = vrot.slane %v171_v58, %v186_v7  ;;  %v2445_v7 = vmov 0.0|0.0  }
 0x162   :  { %v1789_v1 = vadd.f32 %v400_v31, %v2267_v19 }
 0x163   :  { %v1133_v35 = vmul.f32 -1.442695, %v1788_v27 }
 0x164   :  { %v1134_v47 = vmul.f32 -1.442695, %v1789_v1  ;;  %v329_v1 = vadd.f32 %v328_v46, %v2276_v13  ;;  %v2446_v46 = vmov 0.0  }
 0x165   :  { %1812 = vpow2.f32 %v1133_v35  ;;  %v469_v49 = vpop.f32.mrb[2].mxu1 }
 0x166   :  { %v1311_v0 = vpop.f32.mrb[3].mxu1  ;;  %1814 = vpow2.f32 %v1134_v47  ;;  %v493_v31 = vadd.f32 %v2274_v6, %v469_v49 }
 0x16f   :  { %v1813_v12 = vpop.eup %1812 }
 0x170   :  { %v477_v38 = vadd.f32 1.0, %v1813_v12  ;;  %v1815_v56 = vpop.eup %1814 }
 0x171   :  { %v484_v27 = vadd.f32 1.0, %v1815_v56 }
 0x172   :  { %1816 = vrcp.f32 %v477_v38 }
 0x173   :  { %1818 = vrcp.f32 %v484_v27 }
 0x17c   :  { %v1817_v35 = vpop.eup %1816 }
 0x17d   :  { %v494_v0 = vmul.f32 %v1817_v35, %v493_v31  ;;  %v1819_v12 = vpop.eup %1818 }
 0x17e   :  { %v497_v38 = vsub.f32 1.0, %v1819_v12  ;;  %v499_v19 = vmul.f32 %v1819_v12, %v2212_v28 }
 0x17f   :  { %v495_v47 = vadd.f32 %v494_v0, %v329_v1 }
 0x181   :  { %1820 = vtanh.f32 %v495_v47 }
 0x18b   :  { %v1821_v55 = vpop.eup %1820 }
 0x18c   :  { %v498_v8 = vmul.f32 %v1821_v55, %v497_v38 }
 0x18e   :  { %v2281_v62 = vadd.f32 %v499_v19, %v498_v8 }
 0x190   :  { %567 = vmatmul.mubr.f32.vlgmr.msra.gmra.mrb[2].mxu0 %v2281_v62  ;;  %501 = vst [vmem:[#allocation10] sm:$0xff] %v2281_v62  ;;  %1345 = vmatmul.mubr.f32.vlgmr.msra.gmra.mrb[4].mxu1 %v2281_v62 }
 0x191   :  { %1623 = vmatpush1.bf16.msra.mxu0 %v2131_v22  ;;  %1654 = vmatpush3.bf16.msra.mxu1 %v2155_v51 }
 0x192   :  { %1625 = vmatprep.subr.bf16.mxu0 %v2137_v26  ;;  %1655 = vmatprep.subr.bf16.mxu1 %v2445_v7 }
 0x193   :  { %707 = vmatprep.mubr.f32.mxu0 %v2446_v46  ;;  %1379 = vmatprep.mubr.msk.f32.mxu1 %vm1968_vm0, %v2446_v46 }
 0x195   :  { %1627 = vmatpush1.bf16.msra.mxu0 %v2141_v36  ;;  %1657 = vmatpush3.bf16.msra.mxu1 %v2165_v3 }
 0x196   :  { %1629 = vmatprep.subr.bf16.mxu0 %v2147_v39  ;;  %1658 = vmatprep.subr.bf16.mxu1 %v2445_v7 }
 0x199   :  { %1631 = vmatpush1.bf16.msra.mxu0 %v2152_v48  ;;  %1660 = vmatpush3.bf16.msra.mxu1 %v2177_v20 }
 0x19a   :  { %1633 = vmatprep.subr.bf16.mxu0 %v2158_v54  ;;  %1661 = vmatprep.subr.bf16.mxu1 %v2445_v7 }
 0x19d   :  { %1635 = vmatpush1.bf16.msra.mxu0 %v2162_v63  ;;  %1663 = vmatpush3.bf16.msra.mxu1 %v2187_v42 }
 0x19e   :  { %1637 = vmatprep.subr.bf16.mxu0 %v2168_v4  ;;  %1664 = vmatprep.subr.bf16.mxu1 %v2445_v7 }
 0x1a1   :  { %1639 = vmatpush1.bf16.msra.mxu0 %v2174_v18  ;;  %1666 = vmatpush3.bf16.msra.mxu1 %v2197_v60 }
 0x1a2   :  { %1641 = vmatprep.subr.bf16.mxu0 %v2180_v24  ;;  %1667 = vmatprep.subr.bf16.mxu1 %v2445_v7 }
 0x1a5   :  { %1643 = vmatpush1.bf16.msra.mxu0 %v2184_v37  ;;  %1669 = vmatpush3.bf16.msra.mxu1 %v2207_v17 }
 0x1a6   :  { %1645 = vmatprep.subr.bf16.mxu0 %v2190_v45  ;;  %1670 = vmatprep.subr.bf16.mxu1 %v2445_v7 }
 0x1a9   :  { %1647 = vmatpush1.bf16.msra.mxu0 %v2194_v57  ;;  %1672 = vmatpush3.bf16.msra.mxu1 %v2215_v30 }
 0x1aa   :  { %1649 = vmatprep.subr.bf16.mxu0 %v2200_v2  ;;  %1673 = vmatprep.subr.bf16.mxu1 %v2445_v7 }
 0x1ad   :  { %1651 = vmatpush1.bf16.msra.mxu0 %v2204_v14  ;;  %1675 = vmatpush3.bf16.msra.mxu1 %v2221_v40 }
 0x1ae   :  { %1677 = vmatprep.subr.bf16.mxu0 %v2059_v5  ;;  %1708 = vmatprep.subr.bf16.mxu1 %v2445_v7  ;;  %v2447_v5 = vld [vmem:[#allocation15_spill] sm:$0xff] }
 0x1b0   :  { %708 = vmatmul.mubr.f32.vlgmr.msra.gmra.mrb[2].mxu0 %v2281_v62  ;;  %1380 = vmatmul.mubr.f32.vlgmr.msra.gmra.mrb[6].mxu1 %v2281_v62 }
 0x1b1   :  { %1679 = vmatpush1.bf16.msra.mxu0 %v2061_v9  ;;  %1710 = vmatpush3.bf16.msra.mxu1 %v2078_v29  ;;  %v2448_v9 = vld [vmem:[#allocation16_spill] sm:$0xff] }
 0x1b2   :  { %1681 = vmatprep.subr.bf16.mxu0 %v2063_v10  ;;  %1711 = vmatprep.subr.bf16.mxu1 %v2445_v7  ;;  %v2449_v10 = vld [vmem:[#allocation18_spill] sm:$0xff] }
 0x1b3   :  { %872 = vmatprep.mubr.f32.mxu0 %v2446_v46  ;;  %1414 = vmatprep.mubr.msk.f32.mxu1 %vm1968_vm0, %v2446_v46 }
 0x1b5   :  { %1683 = vmatpush1.bf16.msra.mxu0 %v2067_v15  ;;  %1713 = vmatpush3.bf16.msra.mxu1 %v2084_v33  ;;  %v2450_v15 = vld [vmem:[#allocation17_spill] sm:$0xff] }
 0x1b6   :  { %1685 = vmatprep.subr.bf16.mxu0 %v2070_v16  ;;  %1714 = vmatprep.subr.bf16.mxu1 %v2445_v7 }
 0x1b9   :  { %1687 = vmatpush1.bf16.msra.mxu0 %v2073_v21  ;;  %1716 = vmatpush3.bf16.msra.mxu1 %v2094_v43 }
 0x1ba   :  { %1689 = vmatprep.subr.bf16.mxu0 %v2076_v23  ;;  %1717 = vmatprep.subr.bf16.mxu1 %v2445_v7 }
 0x1bd   :  { %1691 = vmatpush1.bf16.msra.mxu0 %v2081_v32  ;;  %1719 = vmatpush3.bf16.msra.mxu1 %v2104_v52  ;;  %v2451_v32 = vld [vmem:[#allocation19_spill] sm:$0xff] }
 0x1be   :  { %1693 = vmatprep.subr.bf16.mxu0 %v2087_v34  ;;  %1720 = vmatprep.subr.bf16.mxu1 %v2445_v7 }
 0x1c1   :  { %1695 = vmatpush1.bf16.msra.mxu0 %v2091_v41  ;;  %1722 = vmatpush3.bf16.msra.mxu1 %v2114_v61 }
 0x1c2   :  { %1697 = vmatprep.subr.bf16.mxu0 %v2097_v44  ;;  %1723 = vmatprep.subr.bf16.mxu1 %v2445_v7  ;;  %v2452_v44 = vld [vmem:[#allocation20_spill] sm:$0xff] }
 0x1c5   :  { %1699 = vmatpush1.bf16.msra.mxu0 %v2101_v50  ;;  %1725 = vmatpush3.bf16.msra.mxu1 %v2124_v11 }
 0x1c6   :  { %1701 = vmatprep.subr.bf16.mxu0 %v2107_v53  ;;  %1726 = vmatprep.subr.bf16.mxu1 %v2445_v7 }
 0x1c9   :  { %1703 = vmatpush1.bf16.msra.mxu0 %v2111_v59  ;;  %1728 = vmatpush3.bf16.msra.mxu1 %v2134_v25 }
 0x1ca   :  { %1705 = vmatprep.subr.bf16.mxu0 %v2447_v5  ;;  %1729 = vmatprep.subr.bf16.mxu1 %v2445_v7 }
 0x1cd   :  { %1707 = vmatpush1.bf16.msra.mxu0 %v2448_v9  ;;  %1731 = vmatpush3.bf16.msra.mxu1 %v2449_v10 }
 0x1ce   :  { %1733 = vmatprep.subr.bf16.mxu0 %v2450_v15  ;;  %1764 = vmatprep.subr.bf16.mxu1 %v2445_v7 }
 0x263   :  { %v639_v16 = vpop.f32.mrb[4].mxu1 }
 0x264   :  { %v1346_v21 = vpop.f32.mrb[5].mxu1  ;;  %v640_v58 = vadd.f32 %v639_v16, %v2276_v13 }
 0x283   :  { %v709_v23 = vpop.f32.mrb[2].mxu0  ;;  %v780_v29 = vpop.f32.mrb[6].mxu1 }
 0x284   :  { %v1790_v33 = vadd.f32 %v709_v23, %v2451_v32  ;;  %v711_v34 = vpop.f32.mrb[3].mxu0  ;;  %v1381_v41 = vpop.f32.mrb[7].mxu1  ;;  %v798_v25 = vadd.f32 %v2274_v6, %v780_v29 }
 0x285   :  { %v1791_v50 = vadd.f32 %v711_v34, %v2452_v44 }
 0x286   :  { %v1136_v43 = vmul.f32 -1.442695, %v1790_v33 }
 0x287   :  { %v1137_v52 = vmul.f32 -1.442695, %v1791_v50 }
 0x288   :  { %1822 = vpow2.f32 %v1136_v43 }
 0x289   :  { %1824 = vpow2.f32 %v1137_v52 }
 0x292   :  { %v1823_v53 = vpop.eup %1822 }
 0x293   :  { %v788_v59 = vadd.f32 1.0, %v1823_v53  ;;  %v1825_v61 = vpop.eup %1824 }
 0x294   :  { %v795_v11 = vadd.f32 1.0, %v1825_v61 }
 0x295   :  { %1826 = vrcp.f32 %v788_v59 }
 0x296   :  { %1828 = vrcp.f32 %v795_v11 }
 0x29f   :  { %v1827_v28 = vpop.eup %1826 }
 0x2a0   :  { %v799_v8 = vmul.f32 %v1827_v28, %v798_v25  ;;  %v1829_v49 = vpop.eup %1828 }
 0x2a1   :  { %v802_v56 = vsub.f32 1.0, %v1829_v49  ;;  %v804_v35 = vmul.f32 %v1829_v49, %v2281_v62 }
 0x2a2   :  { %v800_v19 = vadd.f32 %v799_v8, %v640_v58 }
 0x2a4   :  { %1830 = vtanh.f32 %v800_v19 }
 0x2ae   :  { %v1831_v27 = vpop.eup %1830 }
 0x2af   :  { %v803_v31 = vmul.f32 %v1831_v27, %v802_v56 }
 0x2b1   :  { %v2363_v1 = vadd.f32 %v804_v35, %v803_v31 }
 0x2b3   :  { %873 = vmatmul.mubr.f32.vlgmr.msra.gmra.mrb[4].mxu0 %v2363_v1  ;;  %807 = vst [vmem:[#allocation10 + $0x8] sm:$0xff] %v2363_v1  ;;  %1415 = vmatmul.mubr.f32.vlgmr.msra.gmra.mrb[8].mxu1 %v2363_v1 }
 0x2b4   :  { %1735 = vmatpush1.bf16.msra.mxu0 %v2131_v22  ;;  %1766 = vmatpush3.bf16.msra.mxu1 %v2155_v51 }
 0x2b5   :  { %1737 = vmatprep.subr.bf16.mxu0 %v2137_v26  ;;  %1767 = vmatprep.subr.bf16.mxu1 %v2445_v7 }
 0x2b6   :  { %1013 = vmatprep.mubr.f32.mxu0 %v2446_v46  ;;  %1449 = vmatprep.mubr.msk.f32.mxu1 %vm1968_vm0, %v2446_v46 }
 0x2b8   :  { %1739 = vmatpush1.bf16.msra.mxu0 %v2141_v36  ;;  %1769 = vmatpush3.bf16.msra.mxu1 %v2165_v3 }
 0x2b9   :  { %1741 = vmatprep.subr.bf16.mxu0 %v2147_v39  ;;  %1770 = vmatprep.subr.bf16.mxu1 %v2445_v7 }
 0x2bc   :  { %1743 = vmatpush1.bf16.msra.mxu0 %v2152_v48  ;;  %1772 = vmatpush3.bf16.msra.mxu1 %v2177_v20 }
 0x2bd   :  { %1745 = vmatprep.subr.bf16.mxu0 %v2158_v54  ;;  %1773 = vmatprep.subr.bf16.mxu1 %v2445_v7 }
 0x2c0   :  { %1747 = vmatpush1.bf16.msra.mxu0 %v2162_v63  ;;  %1775 = vmatpush3.bf16.msra.mxu1 %v2187_v42 }
 0x2c1   :  { %1749 = vmatprep.subr.bf16.mxu0 %v2168_v4  ;;  %1776 = vmatprep.subr.bf16.mxu1 %v2445_v7 }
 0x2c4   :  { %1751 = vmatpush1.bf16.msra.mxu0 %v2174_v18  ;;  %1778 = vmatpush3.bf16.msra.mxu1 %v2197_v60 }
 0x2c5   :  { %1753 = vmatprep.subr.bf16.mxu0 %v2180_v24  ;;  %1779 = vmatprep.subr.bf16.mxu1 %v2445_v7 }
 0x2c8   :  { %1755 = vmatpush1.bf16.msra.mxu0 %v2184_v37  ;;  %1781 = vmatpush3.bf16.msra.mxu1 %v2207_v17 }
 0x2c9   :  { %1757 = vmatprep.subr.bf16.mxu0 %v2190_v45  ;;  %1782 = vmatprep.subr.bf16.mxu1 %v2445_v7 }
 0x2cc   :  { %1759 = vmatpush1.bf16.msra.mxu0 %v2194_v57  ;;  %1784 = vmatpush3.bf16.msra.mxu1 %v2215_v30 }
 0x2cd   :  { %1761 = vmatprep.subr.bf16.mxu0 %v2200_v2  ;;  %1785 = vmatprep.subr.bf16.mxu1 %v2445_v7 }
 0x2d0   :  { %1763 = vmatpush1.bf16.msra.mxu0 %v2204_v14  ;;  %1787 = vmatpush3.bf16.msra.mxu1 %v2221_v40 }
 0x2d3   :  { %1014 = vmatmul.mubr.f32.vlgmr.msra.gmra.mrb[4].mxu0 %v2363_v1  ;;  %1450 = vmatmul.mubr.f32.vlgmr.msra.gmra.mrb[10].mxu1 %v2363_v1 }
 0x386   :  { %v945_v62 = vpop.f32.mrb[8].mxu1 }
 0x387   :  { %v1416_v22 = vpop.f32.mrb[9].mxu1  ;;  %v946_v45 = vadd.f32 %v945_v62, %v2276_v13 }
 0x3a6   :  { %v1015_v26 = vpop.f32.mrb[4].mxu0  ;;  %v1086_v36 = vpop.f32.mrb[10].mxu1 }
 0x3a7   :  { %v1792_v39 = vadd.f32 %v1015_v26, %v2451_v32  ;;  %v1017_v48 = vpop.f32.mrb[5].mxu0  ;;  %v1451_v51 = vpop.f32.mrb[11].mxu1  ;;  %v1104_v37 = vadd.f32 %v2274_v6, %v1086_v36 }
 0x3a8   :  { %v1793_v63 = vadd.f32 %v1017_v48, %v2452_v44 }
 0x3a9   :  { %v1138_v54 = vmul.f32 -1.442695, %v1792_v39 }
 0x3aa   :  { %v1139_v3 = vmul.f32 -1.442695, %v1793_v63 }
 0x3ab   :  { %1832 = vpow2.f32 %v1138_v54 }
 0x3ac   :  { %1834 = vpow2.f32 %v1139_v3 }
 0x3b5   :  { %v1833_v4 = vpop.eup %1832 }
 0x3b6   :  { %v1094_v18 = vadd.f32 1.0, %v1833_v4  ;;  %v1835_v20 = vpop.eup %1834 }
 0x3b7   :  { %v1101_v24 = vadd.f32 1.0, %v1835_v20 }
 0x3b8   :  { %1836 = vrcp.f32 %v1094_v18 }
 0x3b9   :  { %1838 = vrcp.f32 %v1101_v24 }
 0x3c2   :  { %v1837_v42 = vpop.eup %1836 }
 0x3c3   :  { %v1105_v57 = vmul.f32 %v1837_v42, %v1104_v37  ;;  %v1839_v2 = vpop.eup %1838 }
 0x3c4   :  { %v1108_v14 = vsub.f32 1.0, %v1839_v2  ;;  %v1110_v40 = vmul.f32 %v1839_v2, %v2363_v1 }
 0x3c5   :  { %v1106_v60 = vadd.f32 %v1105_v57, %v946_v45 }
 0x3c7   :  { %1840 = vtanh.f32 %v1106_v60 }
 0x3d1   :  { %v1841_v17 = vpop.eup %1840 }
 0x3d2   :  { %v1109_v30 = vmul.f32 %v1841_v17, %v1108_v14 }
 0x3d4   :  { %v1111_v0 = vadd.f32 %v1110_v40, %v1109_v30 }
 0x3d6   :  { %1113 = vst [vmem:[#allocation10 + $0x10] sm:$0xff] %v1111_v0 }
 0x3d7   :  { %1941 = shalt.err (!%p1938_p8)
}
 0x3d8   :  { %s1942_s26 = scalar_lea.hbm %s2426_s6, 384 }
 0x3d9   :  { %p1943_p9 = scmp.ne.s32.totalorder %s2426_s6, %s1942_s26  ;;  %p1946_p10 = scmp.lt.u32.totalorder %s1942_s26, %s2426_s6 }
 0x3db   :  { %p1948_p11 = pnand %p1946_p10, %p1943_p9 }
 0x3dd   :  { %1951 = shalt.err (!%p1948_p11)
}
 0x3de   :  { %s1970_s0 = smov 128   ;;  %s1971_s24 = smov 8  }
 0x3df   :  { %1125 = dma.vmem_to_hbm [thread:$0]  %s1120_s21, 384, %s2426_s6, [#allocation4], %s1970_s0, %s1970_s0, %s1971_s24  }
 0x3e0   :  { %1958 = dma.done.wait [#allocation4], 384  }
 0x3e1   :  { %1959 = vsyncadd [#allocation4], 4294966912 }
 0x3e2   :  { %1129 = vsyncpa [#allocation3], 1 }
 0x3e3   :  { %1130 = vsyncpa [#allocation6], 1 }
 0x3e4   :  { %1131 = vsyncpa [#allocation9], 1 }
 0x3e5   :  { %1132 = vsyncpa [#allocation4], 1 }

</bundles_post_ra>
